<compile_context>
chip_gen: v7x
topology: tpu7x:2x2x1
jax: 0.10.0
libtpu: 0.0.40
codegen_flags: <defaults>
</compile_context>

<pallas_src>
from functools import partial

import jax
import jax.numpy as jnp
from jax import lax
from jax.experimental import pallas as pl
from jax.experimental.pallas import tpu as pltpu

_EPS = 1e-19
_VMEM_LIMIT = 48 * 1024 * 1024


def _tail_mask(blk, block_rows, lanes, rows_full, rem):
    """Validity mask for the single block that can contain padding/garbage.

    Element at global row R, lane c is valid iff
        R < rows_full  or  (R == rows_full and c < rem).
    Row and lane are compared separately so there is no int32 flat-index
    overflow for very large inputs.
    """
    r = lax.broadcasted_iota(jnp.int32, (block_rows, lanes), 0)
    c = lax.broadcasted_iota(jnp.int32, (block_rows, lanes), 1)
    grow = blk * block_rows + r
    valid = grow < rows_full
    if rem:
        valid = valid | ((grow == rows_full) & (c < rem))
    return valid


def _stats_kernel(x_ref, t_ref, xmin_ref, xsum_ref, tmin_ref, tsum_ref, *,
                  block_rows, lanes, rows_full, rem, has_tail):
    """Pass 1: per-block partial min / sum of input and target.

    Each grid step reduces its (block_rows, lanes) tile to an (8, lanes) slab
    using only elementwise VPU min/add (rows are grouped by sublane tile via a
    layout-preserving reshape).  The expensive cross-lane reduction happens
    once, outside the kernel, on the tiny (nblocks, 8, lanes) partials.
    Per-block outputs keep the grid axis "parallel" (both TCs on v7x).
    """
    blk = pl.program_id(0)
    g = block_rows // 8

    def body(mask):
        x = x_ref[...].astype(jnp.float32)
        t = t_ref[...].astype(jnp.float32)
        if mask is not None:
            x_mn = jnp.where(mask, x, jnp.float32(jnp.inf))
            t_mn = jnp.where(mask, t, jnp.float32(jnp.inf))
            x_sm = jnp.where(mask, x, jnp.float32(0.0))
            t_sm = jnp.where(mask, t, jnp.float32(0.0))
        else:
            x_mn = x_sm = x
            t_mn = t_sm = t
        xmin_ref[...] = x_mn.reshape(g, 8, lanes).min(axis=0)
        xsum_ref[...] = x_sm.reshape(g, 8, lanes).sum(axis=0)
        tmin_ref[...] = t_mn.reshape(g, 8, lanes).min(axis=0)
        tsum_ref[...] = t_sm.reshape(g, 8, lanes).sum(axis=0)

    if has_tail:
        last = pl.num_programs(0) - 1

        @pl.when(blk != last)
        def _():
            body(None)

        @pl.when(blk == last)
        def _():
            body(_tail_mask(blk, block_rows, lanes, rows_full, rem))
    else:
        body(None)


def _bt_kernel(stats_ref, x_ref, t_ref, out_ref, *,
               block_rows, lanes, rows_full, rem, has_tail, eps):
    """Pass 2: per-block partial Bhattacharyya sums.

    stats_ref (SMEM, scalar-prefetched) holds
        [min(x), 1/sum(x - min x), min(t), 1/sum(t - min t)]
    so no scalar divide sits on the per-step critical path.
    """
    blk = pl.program_id(0)
    g = block_rows // 8
    x_min = stats_ref[0]
    inv_x = stats_ref[1]
    t_min = stats_ref[2]
    inv_t = stats_ref[3]

    def body(mask):
        x = x_ref[...].astype(jnp.float32)
        t = t_ref[...].astype(jnp.float32)
        o2 = (x - x_min) * inv_x
        t2 = (t - t_min) * inv_t
        val = jnp.sqrt(jnp.abs(o2 * t2) + jnp.float32(eps))
        if mask is not None:
            val = jnp.where(mask, val, jnp.float32(0.0))
        out_ref[...] = val.reshape(g, 8, lanes).sum(axis=0)

    if has_tail:
        last = pl.num_programs(0) - 1

        @pl.when(blk != last)
        def _():
            body(None)

        @pl.when(blk == last)
        def _():
            body(_tail_mask(blk, block_rows, lanes, rows_full, rem))
    else:
        body(None)


def bt_loss(x, target, *, max_block_rows=2048):
    """Pallas equivalent of BTLoss().forward(input, target). Returns a scalar."""
    assert x.shape == target.shape, "input and target must have the same shape"

    def prep(a):
        # Stream native narrow floating dtypes; cast to f32 inside the kernel.
        if a.dtype not in (jnp.dtype(jnp.float32), jnp.dtype(jnp.bfloat16),
                           jnp.dtype(jnp.float16)):
            a = a.astype(jnp.float32)
        return jnp.ravel(a)

    xf = prep(x)
    tf = prep(target)
    m = xf.shape[0]

    # Pick the widest lane count (multiple of 128) dividing m so the common
    # case needs no padding copy at all.
    lanes = 512
    for cand in (512, 256, 128):
        if m % cand == 0:
            lanes = cand
            break
    rows_full, rem = divmod(m, lanes)
    rows = rows_full + (1 if rem else 0)
    if rem:
        # Fallback copy only when the flat size is not a multiple of 128.
        pad = rows * lanes - m
        xf = jnp.pad(xf, (0, pad))
        tf = jnp.pad(tf, (0, pad))
    x2 = xf.reshape(rows, lanes)
    t2 = tf.reshape(rows, lanes)

    # Large tiles amortize per-grid-step overhead; multiple of 16 keeps bf16
    # sublane tiling happy. Partial tail tiles are handled by the in-kernel
    # mask (no row-padding copy in HBM).
    max_block_rows = max(16, (max_block_rows // 16) * 16)
    block_rows = min(max_block_rows, ((rows + 15) // 16) * 16)
    nblocks = pl.cdiv(rows, block_rows)
    has_tail = (rows % block_rows != 0) or (rem != 0)

    compiler_params = pltpu.CompilerParams(
        dimension_semantics=("parallel",),
        vmem_limit_bytes=_VMEM_LIMIT,
    )

    in_block = pl.BlockSpec((block_rows, lanes), lambda i: (i, 0))
    part_shape = jax.ShapeDtypeStruct((nblocks, 8, lanes), jnp.float32)
    part_spec = pl.BlockSpec((None, 8, lanes), lambda i: (i, 0, 0))

    # ---------------- pass 1: per-block min / sum partials ----------------
    stats_kernel = partial(_stats_kernel, block_rows=block_rows, lanes=lanes,
                           rows_full=rows_full, rem=rem, has_tail=has_tail)
    pmin_x, psum_x, pmin_t, psum_t = pl.pallas_call(
        stats_kernel,
        out_shape=(part_shape, part_shape, part_shape, part_shape),
        grid=(nblocks,),
        in_specs=[in_block, in_block],
        out_specs=(part_spec, part_spec, part_spec, part_spec),
        compiler_params=compiler_params,
    )(x2, t2)

    # -------- tiny combine: tree reductions + hoisted scalar divides ------
    n = jnp.float32(m)
    x_min = jnp.min(pmin_x)
    t_min = jnp.min(pmin_t)
    # sum(v - min v) == sum(v) - N*min(v)
    x_den = jnp.sum(psum_x) - n * x_min
    t_den = jnp.sum(psum_t) - n * t_min
    # NOTE: constant input/target -> den == 0 -> inf/nan, same as the torch ref.
    stats = jnp.stack([x_min, 1.0 / x_den, t_min, 1.0 / t_den]).astype(jnp.float32)

    # ---------------- pass 2: per-block Bhattacharyya partials ------------
    bt_kernel = partial(_bt_kernel, block_rows=block_rows, lanes=lanes,
                        rows_full=rows_full, rem=rem, has_tail=has_tail,
                        eps=_EPS)
    pbt = pl.pallas_call(
        bt_kernel,
        out_shape=part_shape,
        grid_spec=pltpu.PrefetchScalarGridSpec(
            num_scalar_prefetch=1,
            grid=(nblocks,),
            in_specs=[pl.BlockSpec((block_rows, lanes), lambda i, s: (i, 0)),
                      pl.BlockSpec((block_rows, lanes), lambda i, s: (i, 0))],
            out_specs=pl.BlockSpec((None, 8, lanes), lambda i, s: (i, 0, 0)),
        ),
        compiler_params=compiler_params,
    )(stats, x2, t2)

    return jnp.float32(-2.0) * jnp.sum(pbt)


def _reference_bt_loss(x, target, eps=_EPS):
    """Pure-JAX reference matching the torch BTLoss forward."""
    x = x.astype(jnp.float32)
    target = target.astype(jnp.float32)
    t1 = target - jnp.min(target)
    t2 = t1 / jnp.sum(t1)
    o1 = x - jnp.min(x)
    o2 = o1 / jnp.sum(o1)
    return -2.0 * jnp.sum(jnp.sqrt(jnp.abs(o2 * t2) + eps))


if __name__ == "__main__":
    key = jax.random.PRNGKey(0)
    keys = jax.random.split(key, 6)

    def check(shape, kx, kt):
        # Like the docstring example: input = sigmoid(randn), target = random binary.
        xv = jax.nn.sigmoid(jax.random.normal(kx, shape, dtype=jnp.float32))
        tv = (jax.random.uniform(kt, shape) > 0.5).astype(jnp.float32)
        out = bt_loss(xv, tv)
        jax.block_until_ready(out)
        ref = _reference_bt_loss(xv, tv)
        assert jnp.allclose(out, ref, rtol=1e-4, atol=1e-6), (shape, out, ref)

    check((2, 4, 16, 16), keys[0], keys[1])   # lane-divisible, masked tail path
    check((4, 8, 16, 16), keys[2], keys[3])   # exact block multiple, unmasked path
    check((3, 5, 7), keys[4], keys[5])        # ragged size -> pad fallback path

    print("KERNEL_OK")
</pallas_src>

<mosaic_0001>
module attributes {stable_mosaic.version = 11 : i64} {
  func.func @_stats_kernel(%arg0: i32, %arg1: memref<16x512xf32, #tpu.memory_space<vmem>>, %arg2: memref<16x512xf32, #tpu.memory_space<vmem>>, %arg3: memref<1x8x512xf32, #tpu.memory_space<vmem>>, %arg4: memref<1x8x512xf32, #tpu.memory_space<vmem>>, %arg5: memref<1x8x512xf32, #tpu.memory_space<vmem>>, %arg6: memref<1x8x512xf32, #tpu.memory_space<vmem>>) attributes {dimension_semantics = [#tpu.dimension_semantics<parallel>], iteration_bounds = array<i64: 1>, scalar_prefetch = 0 : i64, scratch_operands = 0 : i64, tpu.core_type = #tpu.core_type<tc>, window_params = [{transform_indices = @transform_0, window_bounds = array<i64: 16, 512>}, {transform_indices = @transform_1, window_bounds = array<i64: 16, 512>}, {transform_indices = @transform_2, window_bounds = array<i64: 1, 8, 512>}, {transform_indices = @transform_3, window_bounds = array<i64: 1, 8, 512>}, {transform_indices = @transform_4, window_bounds = array<i64: 1, 8, 512>}, {transform_indices = @transform_5, window_bounds = array<i64: 1, 8, 512>}]} {
    %c0_i32 = arith.constant 0 : i32
    %0 = arith.cmpi ne, %arg0, %c0_i32 : i32
    %1 = arith.extui %0 : i1 to i32
    %c0_i32_0 = arith.constant 0 : i32
    %2 = arith.cmpi ne, %1, %c0_i32_0 : i32
    scf.if %2 {
      %c0 = arith.constant 0 : index
      %c0_3 = arith.constant 0 : index
      %6 = vector.load %arg1[%c0, %c0_3] : memref<16x512xf32, #tpu.memory_space<vmem>>, vector<16x512xf32>
      %c0_4 = arith.constant 0 : index
      %c0_5 = arith.constant 0 : index
      %7 = vector.load %arg2[%c0_4, %c0_5] : memref<16x512xf32, #tpu.memory_space<vmem>>, vector<16x512xf32>
      %8 = vector.shape_cast %6 : vector<16x512xf32> to vector<2x8x512xf32>
      %cst = arith.constant dense<0x7F800000> : vector<8x512xf32>
      %9 = vector.multi_reduction <minimumf>, %8, %cst [0] : vector<2x8x512xf32> to vector<8x512xf32>
      %c0_6 = arith.constant 0 : index
      %c0_7 = arith.constant 0 : index
      %c0_8 = arith.constant 0 : index
      %10 = vector.load %arg3[%c0_6, %c0_7, %c0_8] : memref<1x8x512xf32, #tpu.memory_space<vmem>>, vector<1x8x512xf32>
      %11 = vector.shape_cast %10 : vector<1x8x512xf32> to vector<8x512xf32>
      %12 = vector.shape_cast %9 : vector<8x512xf32> to vector<1x8x512xf32>
      tpu.vector_store %arg3[%c0_6, %c0_7, %c0_8], %12 {strides = array<i32>} : memref<1x8x512xf32, #tpu.memory_space<vmem>>, vector<1x8x512xf32>,
      %13 = vector.shape_cast %6 : vector<16x512xf32> to vector<2x8x512xf32>
      %cst_9 = arith.constant dense<0.000000e+00> : vector<8x512xf32>
      %14 = vector.multi_reduction <add>, %13, %cst_9 [0] : vector<2x8x512xf32> to vector<8x512xf32>
      %c0_10 = arith.constant 0 : index
      %c0_11 = arith.constant 0 : index
      %c0_12 = arith.constant 0 : index
      %15 = vector.load %arg4[%c0_10, %c0_11, %c0_12] : memref<1x8x512xf32, #tpu.memory_space<vmem>>, vector<1x8x512xf32>
      %16 = vector.shape_cast %15 : vector<1x8x512xf32> to vector<8x512xf32>
      %17 = vector.shape_cast %14 : vector<8x512xf32> to vector<1x8x512xf32>
      tpu.vector_store %arg4[%c0_10, %c0_11, %c0_12], %17 {strides = array<i32>} : memref<1x8x512xf32, #tpu.memory_space<vmem>>, vector<1x8x512xf32>,
      %18 = vector.shape_cast %7 : vector<16x512xf32> to vector<2x8x512xf32>
      %cst_13 = arith.constant dense<0x7F800000> : vector<8x512xf32>
      %19 = vector.multi_reduction <minimumf>, %18, %cst_13 [0] : vector<2x8x512xf32> to vector<8x512xf32>
      %c0_14 = arith.constant 0 : index
      %c0_15 = arith.constant 0 : index
      %c0_16 = arith.constant 0 : index
      %20 = vector.load %arg5[%c0_14, %c0_15, %c0_16] : memref<1x8x512xf32, #tpu.memory_space<vmem>>, vector<1x8x512xf32>
      %21 = vector.shape_cast %20 : vector<1x8x512xf32> to vector<8x512xf32>
      %22 = vector.shape_cast %19 : vector<8x512xf32> to vector<1x8x512xf32>
      tpu.vector_store %arg5[%c0_14, %c0_15, %c0_16], %22 {strides = array<i32>} : memref<1x8x512xf32, #tpu.memory_space<vmem>>, vector<1x8x512xf32>,
      %23 = vector.shape_cast %7 : vector<16x512xf32> to vector<2x8x512xf32>
      %cst_17 = arith.constant dense<0.000000e+00> : vector<8x512xf32>
      %24 = vector.multi_reduction <add>, %23, %cst_17 [0] : vector<2x8x512xf32> to vector<8x512xf32>
      %c0_18 = arith.constant 0 : index
      %c0_19 = arith.constant 0 : index
      %c0_20 = arith.constant 0 : index
      %25 = vector.load %arg6[%c0_18, %c0_19, %c0_20] : memref<1x8x512xf32, #tpu.memory_space<vmem>>, vector<1x8x512xf32>
      %26 = vector.shape_cast %25 : vector<1x8x512xf32> to vector<8x512xf32>
      %27 = vector.shape_cast %24 : vector<8x512xf32> to vector<1x8x512xf32>
      tpu.vector_store %arg6[%c0_18, %c0_19, %c0_20], %27 {strides = array<i32>} : memref<1x8x512xf32, #tpu.memory_space<vmem>>, vector<1x8x512xf32>,
    } else {
    }
    %c0_i32_1 = arith.constant 0 : i32
    %3 = arith.cmpi eq, %arg0, %c0_i32_1 : i32
    %4 = arith.extui %3 : i1 to i32
    %c0_i32_2 = arith.constant 0 : i32
    %5 = arith.cmpi ne, %4, %c0_i32_2 : i32
    scf.if %5 {
      %6 = tpu.iota {dimensions = array<i32: 0>} : vector<16x512xi32>
      %c16_i32 = arith.constant 16 : i32
      %7 = arith.muli %arg0, %c16_i32 : i32
      %8 = vector.broadcast %7 : i32 to vector<16x512xi32>
      %9 = arith.addi %8, %6 : vector<16x512xi32>
      %c4_i32 = arith.constant 4 : i32
      %10 = vector.broadcast %c4_i32 : i32 to vector<16x512xi32>
      %11 = arith.cmpi slt, %9, %10 : vector<16x512xi32>
      %c0 = arith.constant 0 : index
      %c0_3 = arith.constant 0 : index
      %12 = vector.load %arg1[%c0, %c0_3] : memref<16x512xf32, #tpu.memory_space<vmem>>, vector<16x512xf32>
      %c0_4 = arith.constant 0 : index
      %c0_5 = arith.constant 0 : index
      %13 = vector.load %arg2[%c0_4, %c0_5] : memref<16x512xf32, #tpu.memory_space<vmem>>, vector<16x512xf32>
      %cst = arith.constant 0x7F800000 : f32
      %14 = vector.broadcast %cst : f32 to vector<16x512xf32>
      %15 = arith.select %11, %12, %14 : vector<16x512xi1>, vector<16x512xf32>
      %cst_6 = arith.constant 0x7F800000 : f32
      %16 = vector.broadcast %cst_6 : f32 to vector<16x512xf32>
      %17 = arith.select %11, %13, %16 : vector<16x512xi1>, vector<16x512xf32>
      %cst_7 = arith.constant 0.000000e+00 : f32
      %18 = vector.broadcast %cst_7 : f32 to vector<16x512xf32>
      %19 = arith.select %11, %12, %18 : vector<16x512xi1>, vector<16x512xf32>
      %cst_8 = arith.constant 0.000000e+00 : f32
      %20 = vector.broadcast %cst_8 : f32 to vector<16x512xf32>
      %21 = arith.select %11, %13, %20 : vector<16x512xi1>, vector<16x512xf32>
      %22 = vector.shape_cast %15 : vector<16x512xf32> to vector<2x8x512xf32>
      %cst_9 = arith.constant dense<0x7F800000> : vector<8x512xf32>
      %23 = vector.multi_reduction <minimumf>, %22, %cst_9 [0] : vector<2x8x512xf32> to vector<8x512xf32>
      %c0_10 = arith.constant 0 : index
      %c0_11 = arith.constant 0 : index
      %c0_12 = arith.constant 0 : index
      %24 = vector.load %arg3[%c0_10, %c0_11, %c0_12] : memref<1x8x512xf32, #tpu.memory_space<vmem>>, vector<1x8x512xf32>
      %25 = vector.shape_cast %24 : vector<1x8x512xf32> to vector<8x512xf32>
      %26 = vector.shape_cast %23 : vector<8x512xf32> to vector<1x8x512xf32>
      tpu.vector_store %arg3[%c0_10, %c0_11, %c0_12], %26 {strides = array<i32>} : memref<1x8x512xf32, #tpu.memory_space<vmem>>, vector<1x8x512xf32>,
      %27 = vector.shape_cast %19 : vector<16x512xf32> to vector<2x8x512xf32>
      %cst_13 = arith.constant dense<0.000000e+00> : vector<8x512xf32>
      %28 = vector.multi_reduction <add>, %27, %cst_13 [0] : vector<2x8x512xf32> to vector<8x512xf32>
      %c0_14 = arith.constant 0 : index
      %c0_15 = arith.constant 0 : index
      %c0_16 = arith.constant 0 : index
      %29 = vector.load %arg4[%c0_14, %c0_15, %c0_16] : memref<1x8x512xf32, #tpu.memory_space<vmem>>, vector<1x8x512xf32>
      %30 = vector.shape_cast %29 : vector<1x8x512xf32> to vector<8x512xf32>
      %31 = vector.shape_cast %28 : vector<8x512xf32> to vector<1x8x512xf32>
      tpu.vector_store %arg4[%c0_14, %c0_15, %c0_16], %31 {strides = array<i32>} : memref<1x8x512xf32, #tpu.memory_space<vmem>>, vector<1x8x512xf32>,
      %32 = vector.shape_cast %17 : vector<16x512xf32> to vector<2x8x512xf32>
      %cst_17 = arith.constant dense<0x7F800000> : vector<8x512xf32>
      %33 = vector.multi_reduction <minimumf>, %32, %cst_17 [0] : vector<2x8x512xf32> to vector<8x512xf32>
      %c0_18 = arith.constant 0 : index
      %c0_19 = arith.constant 0 : index
      %c0_20 = arith.constant 0 : index
      %34 = vector.load %arg5[%c0_18, %c0_19, %c0_20] : memref<1x8x512xf32, #tpu.memory_space<vmem>>, vector<1x8x512xf32>
      %35 = vector.shape_cast %34 : vector<1x8x512xf32> to vector<8x512xf32>
      %36 = vector.shape_cast %33 : vector<8x512xf32> to vector<1x8x512xf32>
      tpu.vector_store %arg5[%c0_18, %c0_19, %c0_20], %36 {strides = array<i32>} : memref<1x8x512xf32, #tpu.memory_space<vmem>>, vector<1x8x512xf32>,
      %37 = vector.shape_cast %21 : vector<16x512xf32> to vector<2x8x512xf32>
      %cst_21 = arith.constant dense<0.000000e+00> : vector<8x512xf32>
      %38 = vector.multi_reduction <add>, %37, %cst_21 [0] : vector<2x8x512xf32> to vector<8x512xf32>
      %c0_22 = arith.constant 0 : index
      %c0_23 = arith.constant 0 : index
      %c0_24 = arith.constant 0 : index
      %39 = vector.load %arg6[%c0_22, %c0_23, %c0_24] : memref<1x8x512xf32, #tpu.memory_space<vmem>>, vector<1x8x512xf32>
      %40 = vector.shape_cast %39 : vector<1x8x512xf32> to vector<8x512xf32>
      %41 = vector.shape_cast %38 : vector<8x512xf32> to vector<1x8x512xf32>
      tpu.vector_store %arg6[%c0_22, %c0_23, %c0_24], %41 {strides = array<i32>} : memref<1x8x512xf32, #tpu.memory_space<vmem>>, vector<1x8x512xf32>,
    } else {
    }
    return
  }
  func.func @transform_0(%arg0: i32) -> (i32, i32) {
    %c0_i32 = arith.constant 0 : i32
    %c0_i32_0 = arith.constant 0 : i32
    return %arg0, %c0_i32 : i32, i32
  }
  func.func @transform_1(%arg0: i32) -> (i32, i32) {
    %c0_i32 = arith.constant 0 : i32
    %c0_i32_0 = arith.constant 0 : i32
    return %arg0, %c0_i32 : i32, i32
  }
  func.func @transform_2(%arg0: i32) -> (i32, i32, i32) {
    %c0_i32 = arith.constant 0 : i32
    %c0_i32_0 = arith.constant 0 : i32
    %c0_i32_1 = arith.constant 0 : i32
    return %arg0, %c0_i32, %c0_i32_0 : i32, i32, i32
  }
  func.func @transform_3(%arg0: i32) -> (i32, i32, i32) {
    %c0_i32 = arith.constant 0 : i32
    %c0_i32_0 = arith.constant 0 : i32
    %c0_i32_1 = arith.constant 0 : i32
    return %arg0, %c0_i32, %c0_i32_0 : i32, i32, i32
  }
  func.func @transform_4(%arg0: i32) -> (i32, i32, i32) {
    %c0_i32 = arith.constant 0 : i32
    %c0_i32_0 = arith.constant 0 : i32
    %c0_i32_1 = arith.constant 0 : i32
    return %arg0, %c0_i32, %c0_i32_0 : i32, i32, i32
  }
  func.func @transform_5(%arg0: i32) -> (i32, i32, i32) {
    %c0_i32 = arith.constant 0 : i32
    %c0_i32_0 = arith.constant 0 : i32
    %c0_i32_1 = arith.constant 0 : i32
    return %arg0, %c0_i32, %c0_i32_0 : i32, i32, i32
  }
}

</mosaic_0001>

<bundles_post_ra>
// kernel: tpu_custom_call.1
= control target key start
LH: loop header
LB: loop body
LE: loop exit
PB: predicated region body
PF: predicated region fallthrough
CT: control target
= control target key end

     0   :  { %11 = vsyncpa [#allocation3], 0  ;;  %s699_s0 = inlined_call_operand.hbm [shape: f32[4,512], index: 0, kind: input, shape index: {}]   ;;  %s700_s1 = inlined_call_operand.hbm [shape: f32[4,512], index: 1, kind: input, shape index: {}]   ;;  %s701_s2 = inlined_call_operand.hbm [shape: f32[1,8,512], index: 2, kind: output, shape index: {0}]   ;;  %s702_s3 = inlined_call_operand.hbm [shape: f32[1,8,512], index: 3, kind: output, shape index: {1}]   ;;  %s703_s4 = inlined_call_operand.hbm [shape: f32[1,8,512], index: 4, kind: output, shape index: {2}]   ;;  %s704_s5 = inlined_call_operand.hbm [shape: f32[1,8,512], index: 5, kind: output, shape index: {3}]  }
   0x1   :  { %12 = vsyncpa [#allocation6], 0 }
   0x2   :  { %13 = vsyncpa [#allocation4], 0 }
   0x3   :  { %14 = vsyncpa [#allocation9], 0 }
   0x4   :  { %15 = vsyncpa [#allocation12], 0 }
   0x5   :  { %20 = vsyncadd [#allocation3], 768  ;;  %s530_s18 = smov [#allocation2]   ;;  %s388_s22 = scalar_lea.hbm %s699_s0, 256 }
   0x6   :  { %s21_s19 = sshll.u32 %s530_s18, 4  ;;  %p389_p0 = scmp.ne.s32.totalorder %s699_s0, %s388_s22  ;;  %s22_s19 = int_to_ptr.vmem [resolvable:$true] %s21_s19 }
   0x7   :  { %p392_p1 = scmp.lt.u32.totalorder %s388_s22, %s699_s0 }
   0x9   :  { %p394_p2 = pnand %p392_p1, %p389_p0 }
   0xb   :  { %397 = shalt.err (!%p394_p2)
}
   0xc   :  { %s398_s27 = scalar_lea.vmem %s22_s19, 256  ;;  %s402_s28 = scalar_lea.vmem %s22_s19, 1024 }
   0xd   :  { %p399_p3 = scmp.ne.s32.totalorder %s22_s19, %s398_s27  ;;  %p403_p4 = scmp.lt.s32.totalorder %s22_s19, %s22_s19 }
   0xe   :  { %p404_p5 = scmp.lt.s32.totalorder %s402_s28, %s398_s27 }
  0x10   :  { %p405_p6 = por %p404_p5, %p403_p4 }
  0x12   :  { %p406_p7 = pnand %p405_p6, %p399_p3 }
  0x14   :  { %409 = shalt.err (!%p406_p7)
}
  0x15   :  { %s531_s29 = smov 256   ;;  %s532_s30 = smov 16  }
  0x16   :  { %27 = dma.hbm_to_vmem [thread:$0]  %s699_s0, 256, %s22_s19, [#allocation3], %s531_s29, %s531_s29, %s532_s30  }
  0x17   :  { %32 = vsyncadd [#allocation6], 768  ;;  %s533_s8 = smov [#allocation5]   ;;  %s410_s12 = scalar_lea.hbm %s700_s1, 256 }
  0x18   :  { %s33_s9 = sshll.u32 %s533_s8, 4  ;;  %p411_p8 = scmp.ne.s32.totalorder %s700_s1, %s410_s12  ;;  %s34_s9 = int_to_ptr.vmem [resolvable:$true] %s33_s9 }
  0x19   :  { %p414_p9 = scmp.lt.u32.totalorder %s410_s12, %s700_s1 }
  0x1b   :  { %p416_p10 = pnand %p414_p9, %p411_p8 }
  0x1d   :  { %419 = shalt.err (!%p416_p10)
}
  0x1e   :  { %s420_s17 = scalar_lea.vmem %s34_s9, 256  ;;  %s424_s0 = scalar_lea.vmem %s34_s9, 1024 }
  0x1f   :  { %p421_p11 = scmp.ne.s32.totalorder %s34_s9, %s420_s17  ;;  %p425_p12 = scmp.lt.s32.totalorder %s34_s9, %s34_s9 }
  0x20   :  { %p426_p13 = scmp.lt.s32.totalorder %s424_s0, %s420_s17 }
  0x22   :  { %p427_p0 = por %p426_p13, %p425_p12 }
  0x24   :  { %p428_p1 = pnand %p427_p0, %p421_p11 }
  0x26   :  { %431 = shalt.err (!%p428_p1)
}
  0x27   :  { %39 = dma.hbm_to_vmem [thread:$0]  %s700_s1, 256, %s34_s9, [#allocation6], %s531_s29, %s531_s29, %s532_s30  }
  0x28   :  { %520 = dma.done.wait [#allocation3], 1024  }
  0x29   :  { %521 = vsyncadd [#allocation3], 4294966272 }
  0x2a   :  { %522 = dma.done.wait [#allocation6], 1024  }
  0x2b   :  { %523 = vsyncadd [#allocation6], 4294966272  ;;  %v174_v0 = vlaneseq  ;;  %v376_v2 = vld [vmem:[#allocation2] ss:$16 sps:$4 sm:$0xff]   ;;  %s534_s20 = smov [#allocation8]   ;;  %s535_s22 = smov [#allocation7]  }
  0x2c   :  { %s327_s21 = sshll.u32 %s534_s20, 4  ;;  %s317_s23 = sshll.u32 %s535_s22, 4  ;;  %v378_v3 = vld [vmem:[#allocation2 + $0x4] ss:$16 sps:$4 sm:$0xff]   ;;  %v379_v5 = vld [vmem:[#allocation2 + $0x8] ss:$16 sps:$4 sm:$0xff]   ;;  %s605_s21 = int_to_ptr.vmem [resolvable:$true] %s327_s21  ;;  %s615_s23 = int_to_ptr.vmem [resolvable:$true] %s317_s23 }
  0x2d   :  { %v592_v1 = vshrl.u32 %v174_v0, 7  ;;  %s536_s24 = smov [#allocation10]   ;;  %s537_s26 = smov [#allocation11]   ;;  %v381_v6 = vld [vmem:[#allocation2 + $0xc] ss:$16 sps:$4 sm:$0xff]  }
  0x2e   :  { %s337_s25 = sshll.u32 %s536_s24, 4  ;;  %s595_s27 = sshll.u32 %s537_s26, 4  ;;  %v382_v10 = vld [vmem:[#allocation5] ss:$16 sps:$4 sm:$0xff]   ;;  %v384_v15 = vld [vmem:[#allocation5 + $0x4] ss:$16 sps:$4 sm:$0xff]   ;;  %s621_s25 = int_to_ptr.vmem [resolvable:$true] %s337_s25  ;;  %s348_s27 = int_to_ptr.vmem [resolvable:$true] %s595_s27 }
  0x2f   :  { %vm181_vm0 = vcmp.lt.s32.totalorder %v592_v1, 4  ;;  %v385_v17 = vld [vmem:[#allocation5 + $0x8] ss:$16 sps:$4 sm:$0xff]   ;;  %v387_v20 = vld [vmem:[#allocation5 + $0xc] ss:$16 sps:$4 sm:$0xff]   ;;  %s432_s1 = scalar_lea.vmem %s605_s21, 512  ;;  %p437_p3 = scmp.lt.s32.totalorder %s605_s21, %s605_s21 }
  0x30   :  { %v263_v4 = vsel %vm181_vm0, %v376_v2, 0.0  ;;  %v223_v7 = vsel %vm181_vm0, %v376_v2, inf  ;;  %v264_v8 = vsel %vm181_vm0, %v378_v3, 0.0  ;;  %v224_v9 = vsel %vm181_vm0, %v378_v3, inf  ;;  %p433_p2 = scmp.ne.s32.totalorder %s605_s21, %s432_s1  ;;  %p438_p4 = scmp.lt.s32.totalorder %s432_s1, %s432_s1 }
  0x31   :  { %291 = vst [vmem:[#allocation8] sm:$0xff] %v263_v4  ;;  %283 = vst [vmem:[#allocation7] sm:$0xff] %v223_v7  ;;  %v265_v11 = vsel %vm181_vm0, %v379_v5, 0.0  ;;  %v266_v12 = vsel %vm181_vm0, %v381_v6, 0.0  ;;  %v225_v13 = vsel %vm181_vm0, %v379_v5, inf  ;;  %v226_v14 = vsel %vm181_vm0, %v381_v6, inf }
  0x32   :  { %292 = vst [vmem:[#allocation8 + $0x8] sm:$0xff] %v264_v8  ;;  %284 = vst [vmem:[#allocation7 + $0x8] sm:$0xff] %v224_v9  ;;  %v255_v16 = vsel %vm181_vm0, %v382_v10, inf  ;;  %v271_v18 = vsel %vm181_vm0, %v382_v10, 0.0  ;;  %v256_v19 = vsel %vm181_vm0, %v384_v15, inf  ;;  %v272_v21 = vsel %vm181_vm0, %v384_v15, 0.0  ;;  %p439_p5 = por %p438_p4, %p437_p3 }
  0x33   :  { %293 = vst [vmem:[#allocation8 + $0x10] sm:$0xff] %v265_v11  ;;  %294 = vst [vmem:[#allocation8 + $0x18] sm:$0xff] %v266_v12 }
  0x34   :  { %285 = vst [vmem:[#allocation7 + $0x10] sm:$0xff] %v225_v13  ;;  %286 = vst [vmem:[#allocation7 + $0x18] sm:$0xff] %v226_v14  ;;  %p440_p6 = pnand %p439_p5, %p433_p2 }
  0x35   :  { %299 = vst [vmem:[#allocation10] sm:$0xff] %v255_v16  ;;  %307 = vst [vmem:[#allocation11] sm:$0xff] %v271_v18 }
  0x36   :  { %443 = shalt.err (!%p440_p6)
}
  0x37   :  { %s444_s30 = scalar_lea.hbm %s702_s3, 512 }
  0x38   :  { %p445_p7 = scmp.ne.s32.totalorder %s702_s3, %s444_s30  ;;  %p448_p8 = scmp.lt.u32.totalorder %s444_s30, %s702_s3 }
  0x3a   :  { %p450_p9 = pnand %p448_p8, %p445_p7 }
  0x3c   :  { %453 = shalt.err (!%p450_p9)
}
  0x3d   :  { %330 = dma.vmem_to_hbm [thread:$0]  %s605_s21, 512, %s702_s3, [#allocation9]   ;;  %300 = vst [vmem:[#allocation10 + $0x8] sm:$0xff] %v256_v19  ;;  %v257_v22 = vsel %vm181_vm0, %v385_v17, inf  ;;  %308 = vst [vmem:[#allocation11 + $0x8] sm:$0xff] %v272_v21  ;;  %v273_v23 = vsel %vm181_vm0, %v385_v17, 0.0 }
  0x3e   :  { %s454_s12 = scalar_lea.vmem %s615_s23, 512  ;;  %p459_p11 = scmp.lt.s32.totalorder %s615_s23, %s615_s23 }
  0x3f   :  { %p455_p10 = scmp.ne.s32.totalorder %s615_s23, %s454_s12  ;;  %p460_p12 = scmp.lt.s32.totalorder %s454_s12, %s454_s12 }
  0x41   :  { %p461_p13 = por %p460_p12, %p459_p11 }
  0x43   :  { %p462_p0 = pnand %p461_p13, %p455_p10 }
  0x45   :  { %465 = shalt.err (!%p462_p0)
}
  0x46   :  { %s466_s3 = scalar_lea.hbm %s701_s2, 512 }
  0x47   :  { %p467_p1 = scmp.ne.s32.totalorder %s701_s2, %s466_s3  ;;  %p470_p2 = scmp.lt.u32.totalorder %s466_s3, %s701_s2 }
  0x49   :  { %p472_p3 = pnand %p470_p2, %p467_p1 }
  0x4b   :  { %475 = shalt.err (!%p472_p3)
}
  0x4c   :  { %320 = dma.vmem_to_hbm [thread:$0]  %s615_s23, 512, %s701_s2, [#allocation4]   ;;  %301 = vst [vmem:[#allocation10 + $0x10] sm:$0xff] %v257_v22  ;;  %v258_v24 = vsel %vm181_vm0, %v387_v20, inf  ;;  %309 = vst [vmem:[#allocation11 + $0x10] sm:$0xff] %v273_v23  ;;  %v274_v25 = vsel %vm181_vm0, %v387_v20, 0.0 }
  0x4d   :  { %302 = vst [vmem:[#allocation10 + $0x18] sm:$0xff] %v258_v24  ;;  %310 = vst [vmem:[#allocation11 + $0x18] sm:$0xff] %v274_v25  ;;  %s476_s20 = scalar_lea.vmem %s621_s25, 512  ;;  %p481_p5 = scmp.lt.s32.totalorder %s621_s25, %s621_s25 }
  0x4e   :  { %p477_p4 = scmp.ne.s32.totalorder %s621_s25, %s476_s20  ;;  %p482_p6 = scmp.lt.s32.totalorder %s476_s20, %s476_s20 }
  0x50   :  { %p483_p7 = por %p482_p6, %p481_p5 }
  0x52   :  { %p484_p8 = pnand %p483_p7, %p477_p4 }
  0x54   :  { %487 = shalt.err (!%p484_p8)
}
  0x55   :  { %s488_s22 = scalar_lea.hbm %s703_s4, 512 }
  0x56   :  { %p489_p9 = scmp.ne.s32.totalorder %s703_s4, %s488_s22  ;;  %p492_p10 = scmp.lt.u32.totalorder %s488_s22, %s703_s4 }
  0x58   :  { %p494_p11 = pnand %p492_p10, %p489_p9 }
  0x5a   :  { %497 = shalt.err (!%p494_p11)
}
  0x5b   :  { %340 = dma.vmem_to_hbm [thread:$0]  %s621_s25, 512, %s703_s4, [#allocation9]  }
  0x5c   :  { %s498_s30 = scalar_lea.vmem %s348_s27, 512  ;;  %p503_p13 = scmp.lt.s32.totalorder %s348_s27, %s348_s27 }
  0x5d   :  { %p499_p12 = scmp.ne.s32.totalorder %s348_s27, %s498_s30  ;;  %p504_p0 = scmp.lt.s32.totalorder %s498_s30, %s498_s30 }
  0x5f   :  { %p505_p1 = por %p504_p0, %p503_p13 }
  0x61   :  { %p506_p2 = pnand %p505_p1, %p499_p12 }
  0x63   :  { %509 = shalt.err (!%p506_p2)
}
  0x64   :  { %s510_s8 = scalar_lea.hbm %s704_s5, 512 }
  0x65   :  { %p511_p3 = scmp.ne.s32.totalorder %s704_s5, %s510_s8  ;;  %p514_p4 = scmp.lt.u32.totalorder %s510_s8, %s704_s5 }
  0x67   :  { %p516_p5 = pnand %p514_p4, %p511_p3 }
  0x69   :  { %519 = shalt.err (!%p516_p5)
}
  0x6a   :  { %350 = dma.vmem_to_hbm [thread:$0]  %s348_s27, 512, %s704_s5, [#allocation12]  }
  0x6b   :  { %524 = dma.done.wait [#allocation4], 512  }
  0x6c   :  { %525 = vsyncadd [#allocation4], 4294966784 }
  0x6d   :  { %526 = dma.done.wait [#allocation9], 1024  }
  0x6e   :  { %527 = vsyncadd [#allocation9], 4294966272 }
  0x6f   :  { %528 = dma.done.wait [#allocation12], 512  }
  0x70   :  { %529 = vsyncadd [#allocation12], 4294966784 }
  0x71   :  { %363 = vsyncpa [#allocation3], 1 }
  0x72   :  { %364 = vsyncpa [#allocation6], 1 }
  0x73   :  { %365 = vsyncpa [#allocation4], 1 }
  0x74   :  { %366 = vsyncpa [#allocation9], 1 }
  0x75   :  { %367 = vsyncpa [#allocation12], 1 }

</bundles_post_ra>
